<compile_context>
chip_gen: v6e
topology: v6e:2x2x1
jax: 0.10.0
libtpu: 0.0.40
codegen_flags: <defaults>
</compile_context>

<pallas_src>
import functools

import jax
import jax.numpy as jnp
from jax import lax
from jax.experimental import pallas as pl
from jax.experimental.pallas import tpu as pltpu


_COMPILER_PARAMS = pltpu.CompilerParams(
    dimension_semantics=("parallel",),
    vmem_limit_bytes=48 * 1024 * 1024,
)


def _ln(x, g, b, eps=1e-5):
    """LayerNorm over the last dim, all math in f32."""
    mu = jnp.mean(x, axis=-1, keepdims=True)
    xc = x - mu
    var = jnp.mean(xc * xc, axis=-1, keepdims=True)
    return xc * lax.rsqrt(var + eps) * g + b


def _pick_rb(B, max_rb=8):
    """Largest divisor of B that is <= max_rb, preferring a grid of >= 2 steps
    (v7x has 2 TensorCores; a 1-step grid would leave one idle)."""
    cands = [d for d in range(1, min(max_rb, B) + 1) if B % d == 0]
    two_step = [d for d in cands if B // d >= 2]
    return max(two_step) if two_step else max(cands)


# ---- fused kernel A: ln_1 + QKV + causal MHA + out-proj + residual add ----- #

def _attn_block_kernel(x_ref, g1_ref, b1_ref, wqkv_ref, bqkv_ref,
                       wout_ref, bout_ref, o_ref, attn_scr,
                       *, n_heads, scale):
    RB, L, D = x_ref.shape
    Dh = D // n_heads

    x = x_ref[...].astype(jnp.float32)                       # [RB, L, D]
    xf = x.reshape(RB * L, D)

    # ln_1 + QKV projection; qkv lives only in VMEM
    xn = _ln(xf, g1_ref[...], b1_ref[...])
    qkv = jnp.dot(xn.astype(jnp.bfloat16), wqkv_ref[...],     # bf16 x bf16 -> f32
                  preferred_element_type=jnp.float32) + bqkv_ref[...]
    qkv = qkv.reshape(RB, L, 3 * D)

    # causal additive mask generated in-kernel (f32; softmax stays f32)
    row = lax.broadcasted_iota(jnp.int32, (L, L), 0)
    col = lax.broadcasted_iota(jnp.int32, (L, L), 1)
    mask = jnp.where(row >= col, 0.0, -1e9).astype(jnp.float32)

    # Static head loop; each head's output goes to the bf16 VMEM scratch so the
    # out-projection below is a single K=D matmul.
    # TODO(synk): if bundle dumps show vreg spills at n_heads=8, convert to
    # lax.fori_loop with pl.ds(h*Dh, Dh) to bound live ranges.
    for h in range(n_heads):
        q = (qkv[:, :, h * Dh:(h + 1) * Dh] * scale).astype(jnp.bfloat16)
        k = qkv[:, :, D + h * Dh:D + (h + 1) * Dh].astype(jnp.bfloat16)
        v = qkv[:, :, 2 * D + h * Dh:2 * D + (h + 1) * Dh].astype(jnp.bfloat16)

        s = jnp.einsum('rqd,rkd->rqk', q, k,
                       preferred_element_type=jnp.float32)    # [RB, L, L]
        s = s + mask[None]
        m = jnp.max(s, axis=-1, keepdims=True)
        p = jnp.exp(s - m)
        l = jnp.sum(p, axis=-1, keepdims=True)
        p = p * pl.reciprocal(l, approx=True)

        o_h = jnp.einsum('rqk,rkd->rqd', p.astype(jnp.bfloat16), v,
                         preferred_element_type=jnp.float32)  # [RB, L, Dh]
        attn_scr[:, :, h * Dh:(h + 1) * Dh] = o_h.astype(attn_scr.dtype)

    # single out-projection with full contraction depth K = D
    a = attn_scr[...].reshape(RB * L, D)                      # bf16
    out = jnp.dot(a, wout_ref[...],
                  preferred_element_type=jnp.float32) + bout_ref[...]
    o_ref[...] = (x + out.reshape(RB, L, D)).astype(o_ref.dtype)


def attn_block(x, g1, b1, w_qkv, b_qkv, w_out, b_out, *, n_heads, scale, rb):
    B, L, D = x.shape
    N3 = w_qkv.shape[1]
    return pl.pallas_call(
        functools.partial(_attn_block_kernel, n_heads=n_heads, scale=scale),
        grid=(B // rb,),
        in_specs=[
            pl.BlockSpec((rb, L, D), lambda i: (i, 0, 0)),     # activation tile
            pl.BlockSpec((1, D), lambda i: (0, 0)),            # resident params
            pl.BlockSpec((1, D), lambda i: (0, 0)),
            pl.BlockSpec((D, N3), lambda i: (0, 0)),
            pl.BlockSpec((1, N3), lambda i: (0, 0)),
            pl.BlockSpec((D, D), lambda i: (0, 0)),
            pl.BlockSpec((1, D), lambda i: (0, 0)),
        ],
        out_specs=pl.BlockSpec((rb, L, D), lambda i: (i, 0, 0)),
        out_shape=jax.ShapeDtypeStruct((B, L, D), jnp.float32),
        scratch_shapes=[pltpu.VMEM((rb, L, D), jnp.bfloat16)],
        compiler_params=_COMPILER_PARAMS,
    )(x, g1, b1, w_qkv, b_qkv, w_out, b_out)


# ------- fused kernel B: ln_2 + fc + QuickGELU + proj + residual add -------- #

def _ln_mlp_res_kernel(x_ref, g_ref, b_ref, w1_ref, b1_ref, w2_ref, b2_ref, o_ref):
    RB, L, D = x_ref.shape
    x = x_ref[...].astype(jnp.float32)                        # [RB, L, D]
    xf = x.reshape(RB * L, D)
    xn = _ln(xf, g_ref[...], b_ref[...])
    h = jnp.dot(xn.astype(jnp.bfloat16), w1_ref[...],
                preferred_element_type=jnp.float32) + b1_ref[...]
    h = h * jax.nn.sigmoid(1.702 * h)                         # QuickGELU (f32)
    m = jnp.dot(h.astype(jnp.bfloat16), w2_ref[...],
                preferred_element_type=jnp.float32) + b2_ref[...]
    o_ref[...] = (x + m.reshape(RB, L, D)).astype(o_ref.dtype)


def ln_mlp_residual(x, g, b, w_fc, b_fc, w_proj, b_proj, *, rb):
    B, L, D = x.shape
    H4 = w_fc.shape[1]
    return pl.pallas_call(
        _ln_mlp_res_kernel,
        grid=(B // rb,),
        in_specs=[
            pl.BlockSpec((rb, L, D), lambda i: (i, 0, 0)),
            pl.BlockSpec((1, D), lambda i: (0, 0)),
            pl.BlockSpec((1, D), lambda i: (0, 0)),
            pl.BlockSpec((D, H4), lambda i: (0, 0)),            # resident bf16 weights
            pl.BlockSpec((1, H4), lambda i: (0, 0)),
            pl.BlockSpec((H4, D), lambda i: (0, 0)),
            pl.BlockSpec((1, D), lambda i: (0, 0)),
        ],
        out_specs=pl.BlockSpec((rb, L, D), lambda i: (i, 0, 0)),
        out_shape=jax.ShapeDtypeStruct((B, L, D), jnp.float32),
        compiler_params=_COMPILER_PARAMS,
    )(x, g, b, w_fc, b_fc, w_proj, b_proj)


# ------------------------------- model / params ----------------------------- #

def init_params(key, *, n_layers, n_heads, L, D, proj_dim):
    def nrm(k, shape, dtype=jnp.float32, scale=0.02):
        return (scale * jax.random.normal(k, shape, dtype=jnp.float32)).astype(dtype)

    keys = jax.random.split(key, 2 + n_layers)
    params = {
        'pos': nrm(keys[0], (L, D)),                                 # f32
        'lnf_g': jnp.ones((D,), jnp.float32),
        'lnf_b': jnp.zeros((D,), jnp.float32),
        'text_projection': nrm(keys[1], (D, proj_dim), jnp.bfloat16),
        'layers': [],
    }
    for i in range(n_layers):
        lk = jax.random.split(keys[2 + i], 4)
        params['layers'].append({
            'ln1_g': jnp.ones((1, D), jnp.float32),
            'ln1_b': jnp.zeros((1, D), jnp.float32),
            'w_qkv': nrm(lk[0], (D, 3 * D), jnp.bfloat16),
            'b_qkv': jnp.zeros((1, 3 * D), jnp.float32),
            'w_out': nrm(lk[1], (D, D), jnp.bfloat16),
            'b_out': jnp.zeros((1, D), jnp.float32),
            'ln2_g': jnp.ones((1, D), jnp.float32),
            'ln2_b': jnp.zeros((1, D), jnp.float32),
            'w_fc': nrm(lk[2], (D, 4 * D), jnp.bfloat16),
            'b_fc': jnp.zeros((1, 4 * D), jnp.float32),
            'w_proj': nrm(lk[3], (4 * D, D), jnp.bfloat16),
            'b_proj': jnp.zeros((1, D), jnp.float32),
        })
    return params


def text_encoder_forward(params, prompts, tokenized_prompts, *, n_heads):
    """Mirrors TextEncoder.forward(prompts, tokenized_prompts)."""
    B, L, D = prompts.shape
    Dh = D // n_heads
    scale = 1.0 / (Dh ** 0.5)
    rb = _pick_rb(B)

    # x = prompts + positional_embedding  (plain-JAX elementwise; XLA fuses)
    x = prompts + params['pos'][None]

    for layer in params['layers']:
        x = attn_block(x, layer['ln1_g'], layer['ln1_b'],
                       layer['w_qkv'], layer['b_qkv'],
                       layer['w_out'], layer['b_out'],
                       n_heads=n_heads, scale=scale, rb=rb)          # [B, L, D]
        x = ln_mlp_residual(x, layer['ln2_g'], layer['ln2_b'],
                            layer['w_fc'], layer['b_fc'],
                            layer['w_proj'], layer['b_proj'], rb=rb) # [B, L, D]

    # EOT gather + ln_final + text_projection: only B rows -> plain JAX.
    # (LayerNorm is per-token, so gathering then normalizing == original order.)
    # NOTE: argmax-as-EOT assumes CLIP's tokenizer (EOT has the highest id).
    eot_idx = jnp.argmax(tokenized_prompts, axis=-1)                 # [B]
    x_eot = x[jnp.arange(B), eot_idx]                                # [B, D]
    x_eot = _ln(x_eot, params['lnf_g'], params['lnf_b'])
    return jnp.dot(x_eot.astype(jnp.bfloat16), params['text_projection'],
                   preferred_element_type=jnp.float32)               # [B, proj]


# ------------------------------------ main ---------------------------------- #

if __name__ == "__main__":
    B, L, D = 2, 8, 32
    n_heads, n_layers, proj_dim = 4, 2, 32

    key = jax.random.PRNGKey(0)
    k_params, k_prompts, k_tok = jax.random.split(key, 3)

    params = init_params(k_params, n_layers=n_layers, n_heads=n_heads,
                         L=L, D=D, proj_dim=proj_dim)

    prompts = jax.random.normal(k_prompts, (B, L, D), dtype=jnp.float32)

    # synthetic tokenized prompts; EOT (largest token id) at positions 5 and 7
    tokenized_prompts = jax.random.randint(k_tok, (B, L), 1, 1000, dtype=jnp.int32)
    tokenized_prompts = tokenized_prompts.at[0, 5].set(49407)
    tokenized_prompts = tokenized_prompts.at[1, 7].set(49407)

    fwd = jax.jit(functools.partial(text_encoder_forward, n_heads=n_heads))
    out = fwd(params, prompts, tokenized_prompts)
    out = jax.block_until_ready(out)

    assert out.shape == (B, proj_dim)
    print("KERNEL_OK")
</pallas_src>

<mosaic_0001>
module attributes {stable_mosaic.version = 11 : i64} {
  func.func @_ln_mlp_res_kernel(%arg0: i32, %arg1: memref<1x8x32xf32, #tpu.memory_space<vmem>>, %arg2: memref<1x32xf32, #tpu.memory_space<vmem>>, %arg3: memref<1x32xf32, #tpu.memory_space<vmem>>, %arg4: memref<32x128xbf16, #tpu.memory_space<vmem>>, %arg5: memref<1x128xf32, #tpu.memory_space<vmem>>, %arg6: memref<128x32xbf16, #tpu.memory_space<vmem>>, %arg7: memref<1x32xf32, #tpu.memory_space<vmem>>, %arg8: memref<1x8x32xf32, #tpu.memory_space<vmem>>) attributes {dimension_semantics = [#tpu.dimension_semantics<parallel>], iteration_bounds = array<i64: 2>, scalar_prefetch = 0 : i64, scratch_operands = 0 : i64, tpu.core_type = #tpu.core_type<tc>, window_params = [{transform_indices = @transform_0, window_bounds = array<i64: 1, 8, 32>}, {pipeline_mode = #tpu.pipeline_mode<synchronous>, transform_indices = @transform_1, window_bounds = array<i64: 1, 32>}, {pipeline_mode = #tpu.pipeline_mode<synchronous>, transform_indices = @transform_2, window_bounds = array<i64: 1, 32>}, {pipeline_mode = #tpu.pipeline_mode<synchronous>, transform_indices = @transform_3, window_bounds = array<i64: 32, 128>}, {pipeline_mode = #tpu.pipeline_mode<synchronous>, transform_indices = @transform_4, window_bounds = array<i64: 1, 128>}, {pipeline_mode = #tpu.pipeline_mode<synchronous>, transform_indices = @transform_5, window_bounds = array<i64: 128, 32>}, {pipeline_mode = #tpu.pipeline_mode<synchronous>, transform_indices = @transform_6, window_bounds = array<i64: 1, 32>}, {transform_indices = @transform_7, window_bounds = array<i64: 1, 8, 32>}]} {
    %c0 = arith.constant 0 : index
    %c0_0 = arith.constant 0 : index
    %c0_1 = arith.constant 0 : index
    %0 = vector.load %arg1[%c0, %c0_0, %c0_1] : memref<1x8x32xf32, #tpu.memory_space<vmem>>, vector<1x8x32xf32>
    %1 = vector.shape_cast %0 : vector<1x8x32xf32> to vector<8x32xf32>
    %c0_2 = arith.constant 0 : index
    %c0_3 = arith.constant 0 : index
    %2 = vector.load %arg2[%c0_2, %c0_3] : memref<1x32xf32, #tpu.memory_space<vmem>>, vector<1x32xf32>
    %c0_4 = arith.constant 0 : index
    %c0_5 = arith.constant 0 : index
    %3 = vector.load %arg3[%c0_4, %c0_5] : memref<1x32xf32, #tpu.memory_space<vmem>>, vector<1x32xf32>
    %cst = arith.constant dense<0.000000e+00> : vector<8xf32>
    %4 = vector.multi_reduction <add>, %1, %cst [1] : vector<8x32xf32> to vector<8xf32>
    %5 = vector.shape_cast %4 : vector<8xf32> to vector<8x1xf32>
    %cst_6 = arith.constant 3.200000e+01 : f32
    %6 = vector.broadcast %cst_6 : f32 to vector<8x1xf32>
    %7 = arith.divf %5, %6 : vector<8x1xf32>
    %8 = vector.broadcast %7 : vector<8x1xf32> to vector<8x32xf32>
    %9 = arith.subf %1, %8 : vector<8x32xf32>
    %10 = arith.mulf %9, %9 : vector<8x32xf32>
    %cst_7 = arith.constant dense<0.000000e+00> : vector<8xf32>
    %11 = vector.multi_reduction <add>, %10, %cst_7 [1] : vector<8x32xf32> to vector<8xf32>
    %12 = vector.shape_cast %11 : vector<8xf32> to vector<8x1xf32>
    %cst_8 = arith.constant 3.200000e+01 : f32
    %13 = vector.broadcast %cst_8 : f32 to vector<8x1xf32>
    %14 = arith.divf %12, %13 : vector<8x1xf32>
    %cst_9 = arith.constant 9.99999974E-6 : f32
    %15 = vector.broadcast %cst_9 : f32 to vector<8x1xf32>
    %16 = arith.addf %14, %15 : vector<8x1xf32>
    %17 = math.rsqrt %16 : vector<8x1xf32>
    %18 = vector.broadcast %17 : vector<8x1xf32> to vector<8x32xf32>
    %19 = arith.mulf %9, %18 : vector<8x32xf32>
    %20 = vector.broadcast %2 : vector<1x32xf32> to vector<8x32xf32>
    %21 = arith.mulf %19, %20 : vector<8x32xf32>
    %22 = vector.broadcast %3 : vector<1x32xf32> to vector<8x32xf32>
    %23 = arith.addf %21, %22 : vector<8x32xf32>
    %24 = arith.truncf %23 : vector<8x32xf32> to vector<8x32xbf16>
    %c0_10 = arith.constant 0 : index
    %c0_11 = arith.constant 0 : index
    %25 = vector.load %arg4[%c0_10, %c0_11] : memref<32x128xbf16, #tpu.memory_space<vmem>>, vector<32x128xbf16>
    %cst_12 = arith.constant dense<0.000000e+00> : vector<8x128xf32>
    %26 = tpu.matmul %24, %25, %cst_12 {dimension_numbers = #tpu.dot_dimension_numbers<[1], [0], [0], [1], [0, 0, 1, 1], [], []>} : vector<8x32xbf16>, vector<32x128xbf16>, vector<8x128xf32> -> vector<8x128xf32>
    %c0_13 = arith.constant 0 : index
    %c0_14 = arith.constant 0 : index
    %27 = vector.load %arg5[%c0_13, %c0_14] : memref<1x128xf32, #tpu.memory_space<vmem>>, vector<1x128xf32>
    %28 = vector.broadcast %27 : vector<1x128xf32> to vector<8x128xf32>
    %29 = arith.addf %26, %28 : vector<8x128xf32>
    %cst_15 = arith.constant 1.702000e+00 : f32
    %30 = vector.broadcast %cst_15 : f32 to vector<8x128xf32>
    %31 = arith.mulf %30, %29 : vector<8x128xf32>
    %32 = arith.negf %31 : vector<8x128xf32>
    %33 = math.exp %32 : vector<8x128xf32>
    %cst_16 = arith.constant 1.000000e+00 : f32
    %34 = vector.broadcast %cst_16 : f32 to vector<8x128xf32>
    %35 = arith.addf %34, %33 : vector<8x128xf32>
    %36 = arith.divf %34, %35 : vector<8x128xf32>
    %37 = arith.mulf %29, %36 : vector<8x128xf32>
    %38 = arith.truncf %37 : vector<8x128xf32> to vector<8x128xbf16>
    %c0_17 = arith.constant 0 : index
    %c0_18 = arith.constant 0 : index
    %39 = vector.load %arg6[%c0_17, %c0_18] : memref<128x32xbf16, #tpu.memory_space<vmem>>, vector<128x32xbf16>
    %cst_19 = arith.constant dense<0.000000e+00> : vector<8x32xf32>
    %40 = tpu.matmul %38, %39, %cst_19 {dimension_numbers = #tpu.dot_dimension_numbers<[1], [0], [0], [1], [0, 0, 1, 1], [], []>} : vector<8x128xbf16>, vector<128x32xbf16>, vector<8x32xf32> -> vector<8x32xf32>
    %c0_20 = arith.constant 0 : index
    %c0_21 = arith.constant 0 : index
    %41 = vector.load %arg7[%c0_20, %c0_21] : memref<1x32xf32, #tpu.memory_space<vmem>>, vector<1x32xf32>
    %42 = vector.broadcast %41 : vector<1x32xf32> to vector<8x32xf32>
    %43 = arith.addf %40, %42 : vector<8x32xf32>
    %44 = vector.shape_cast %43 : vector<8x32xf32> to vector<1x8x32xf32>
    %45 = arith.addf %0, %44 : vector<1x8x32xf32>
    %c0_22 = arith.constant 0 : index
    %c0_23 = arith.constant 0 : index
    %c0_24 = arith.constant 0 : index
    %46 = vector.load %arg8[%c0_22, %c0_23, %c0_24] : memref<1x8x32xf32, #tpu.memory_space<vmem>>, vector<1x8x32xf32>
    tpu.vector_store %arg8[%c0_22, %c0_23, %c0_24], %45 {strides = array<i32>} : memref<1x8x32xf32, #tpu.memory_space<vmem>>, vector<1x8x32xf32>,
    return
  }
  func.func @transform_0(%arg0: i32) -> (i32, i32, i32) {
    %c0_i32 = arith.constant 0 : i32
    %c0_i32_0 = arith.constant 0 : i32
    %c0_i32_1 = arith.constant 0 : i32
    return %arg0, %c0_i32, %c0_i32_0 : i32, i32, i32
  }
  func.func @transform_1(%arg0: i32) -> (i32, i32) {
    %c0_i32 = arith.constant 0 : i32
    %c0_i32_0 = arith.constant 0 : i32
    %c0_i32_1 = arith.constant 0 : i32
    return %c0_i32, %c0_i32_0 : i32, i32
  }
  func.func @transform_2(%arg0: i32) -> (i32, i32) {
    %c0_i32 = arith.constant 0 : i32
    %c0_i32_0 = arith.constant 0 : i32
    %c0_i32_1 = arith.constant 0 : i32
    return %c0_i32, %c0_i32_0 : i32, i32
  }
  func.func @transform_3(%arg0: i32) -> (i32, i32) {
    %c0_i32 = arith.constant 0 : i32
    %c0_i32_0 = arith.constant 0 : i32
    %c0_i32_1 = arith.constant 0 : i32
    return %c0_i32, %c0_i32_0 : i32, i32
  }
  func.func @transform_4(%arg0: i32) -> (i32, i32) {
    %c0_i32 = arith.constant 0 : i32
    %c0_i32_0 = arith.constant 0 : i32
    %c0_i32_1 = arith.constant 0 : i32
    return %c0_i32, %c0_i32_0 : i32, i32
  }
  func.func @transform_5(%arg0: i32) -> (i32, i32) {
    %c0_i32 = arith.constant 0 : i32
    %c0_i32_0 = arith.constant 0 : i32
    %c0_i32_1 = arith.constant 0 : i32
    return %c0_i32, %c0_i32_0 : i32, i32
  }
  func.func @transform_6(%arg0: i32) -> (i32, i32) {
    %c0_i32 = arith.constant 0 : i32
    %c0_i32_0 = arith.constant 0 : i32
    %c0_i32_1 = arith.constant 0 : i32
    return %c0_i32, %c0_i32_0 : i32, i32
  }
  func.func @transform_7(%arg0: i32) -> (i32, i32, i32) {
    %c0_i32 = arith.constant 0 : i32
    %c0_i32_0 = arith.constant 0 : i32
    %c0_i32_1 = arith.constant 0 : i32
    return %arg0, %c0_i32, %c0_i32_0 : i32, i32, i32
  }
}

module attributes {stable_mosaic.version = 11 : i64} {
  func.func @_attn_block_kernel(%arg0: i32, %arg1: memref<1x8x32xf32, #tpu.memory_space<vmem>>, %arg2: memref<1x32xf32, #tpu.memory_space<vmem>>, %arg3: memref<1x32xf32, #tpu.memory_space<vmem>>, %arg4: memref<32x96xbf16, #tpu.memory_space<vmem>>, %arg5: memref<1x96xf32, #tpu.memory_space<vmem>>, %arg6: memref<32x32xbf16, #tpu.memory_space<vmem>>, %arg7: memref<1x32xf32, #tpu.memory_space<vmem>>, %arg8: memref<1x8x32xf32, #tpu.memory_space<vmem>>, %arg9: memref<1x8x32xbf16, #tpu.memory_space<vmem>>) attributes {dimension_semantics = [#tpu.dimension_semantics<parallel>], iteration_bounds = array<i64: 2>, scalar_prefetch = 0 : i64, scratch_operands = 1 : i64, tpu.core_type = #tpu.core_type<tc>, window_params = [{transform_indices = @transform_0, window_bounds = array<i64: 1, 8, 32>}, {pipeline_mode = #tpu.pipeline_mode<synchronous>, transform_indices = @transform_1, window_bounds = array<i64: 1, 32>}, {pipeline_mode = #tpu.pipeline_mode<synchronous>, transform_indices = @transform_2, window_bounds = array<i64: 1, 32>}, {pipeline_mode = #tpu.pipeline_mode<synchronous>, transform_indices = @transform_3, window_bounds = array<i64: 32, 96>}, {pipeline_mode = #tpu.pipeline_mode<synchronous>, transform_indices = @transform_4, window_bounds = array<i64: 1, 96>}, {pipeline_mode = #tpu.pipeline_mode<synchronous>, transform_indices = @transform_5, window_bounds = array<i64: 32, 32>}, {pipeline_mode = #tpu.pipeline_mode<synchronous>, transform_indices = @transform_6, window_bounds = array<i64: 1, 32>}, {transform_indices = @transform_7, window_bounds = array<i64: 1, 8, 32>}]} {
    %c0 = arith.constant 0 : index
    %c0_0 = arith.constant 0 : index
    %c0_1 = arith.constant 0 : index
    %0 = vector.load %arg1[%c0, %c0_0, %c0_1] : memref<1x8x32xf32, #tpu.memory_space<vmem>>, vector<1x8x32xf32>
    %1 = vector.shape_cast %0 : vector<1x8x32xf32> to vector<8x32xf32>
    %c0_2 = arith.constant 0 : index
    %c0_3 = arith.constant 0 : index
    %2 = vector.load %arg2[%c0_2, %c0_3] : memref<1x32xf32, #tpu.memory_space<vmem>>, vector<1x32xf32>
    %c0_4 = arith.constant 0 : index
    %c0_5 = arith.constant 0 : index
    %3 = vector.load %arg3[%c0_4, %c0_5] : memref<1x32xf32, #tpu.memory_space<vmem>>, vector<1x32xf32>
    %cst = arith.constant dense<0.000000e+00> : vector<8xf32>
    %4 = vector.multi_reduction <add>, %1, %cst [1] : vector<8x32xf32> to vector<8xf32>
    %5 = vector.shape_cast %4 : vector<8xf32> to vector<8x1xf32>
    %cst_6 = arith.constant 3.200000e+01 : f32
    %6 = vector.broadcast %cst_6 : f32 to vector<8x1xf32>
    %7 = arith.divf %5, %6 : vector<8x1xf32>
    %8 = vector.broadcast %7 : vector<8x1xf32> to vector<8x32xf32>
    %9 = arith.subf %1, %8 : vector<8x32xf32>
    %10 = arith.mulf %9, %9 : vector<8x32xf32>
    %cst_7 = arith.constant dense<0.000000e+00> : vector<8xf32>
    %11 = vector.multi_reduction <add>, %10, %cst_7 [1] : vector<8x32xf32> to vector<8xf32>
    %12 = vector.shape_cast %11 : vector<8xf32> to vector<8x1xf32>
    %cst_8 = arith.constant 3.200000e+01 : f32
    %13 = vector.broadcast %cst_8 : f32 to vector<8x1xf32>
    %14 = arith.divf %12, %13 : vector<8x1xf32>
    %cst_9 = arith.constant 9.99999974E-6 : f32
    %15 = vector.broadcast %cst_9 : f32 to vector<8x1xf32>
    %16 = arith.addf %14, %15 : vector<8x1xf32>
    %17 = math.rsqrt %16 : vector<8x1xf32>
    %18 = vector.broadcast %17 : vector<8x1xf32> to vector<8x32xf32>
    %19 = arith.mulf %9, %18 : vector<8x32xf32>
    %20 = vector.broadcast %2 : vector<1x32xf32> to vector<8x32xf32>
    %21 = arith.mulf %19, %20 : vector<8x32xf32>
    %22 = vector.broadcast %3 : vector<1x32xf32> to vector<8x32xf32>
    %23 = arith.addf %21, %22 : vector<8x32xf32>
    %24 = arith.truncf %23 : vector<8x32xf32> to vector<8x32xbf16>
    %c0_10 = arith.constant 0 : index
    %c0_11 = arith.constant 0 : index
    %25 = vector.load %arg4[%c0_10, %c0_11] : memref<32x96xbf16, #tpu.memory_space<vmem>>, vector<32x96xbf16>
    %cst_12 = arith.constant dense<0.000000e+00> : vector<8x96xf32>
    %26 = tpu.matmul %24, %25, %cst_12 {dimension_numbers = #tpu.dot_dimension_numbers<[1], [0], [0], [1], [0, 0, 1, 1], [], []>} : vector<8x32xbf16>, vector<32x96xbf16>, vector<8x96xf32> -> vector<8x96xf32>
    %c0_13 = arith.constant 0 : index
    %c0_14 = arith.constant 0 : index
    %27 = vector.load %arg5[%c0_13, %c0_14] : memref<1x96xf32, #tpu.memory_space<vmem>>, vector<1x96xf32>
    %28 = vector.broadcast %27 : vector<1x96xf32> to vector<8x96xf32>
    %29 = arith.addf %26, %28 : vector<8x96xf32>
    %30 = vector.shape_cast %29 : vector<8x96xf32> to vector<1x8x96xf32>
    %31 = tpu.iota {dimensions = array<i32: 0>} : vector<8x8xi32>
    %32 = tpu.iota {dimensions = array<i32: 1>} : vector<8x8xi32>
    %33 = arith.cmpi sge, %31, %32 : vector<8x8xi32>
    %cst_15 = arith.constant 0.000000e+00 : f32
    %cst_16 = arith.constant -1.000000e+09 : f32
    %34 = vector.broadcast %cst_15 : f32 to vector<8x8xf32>
    %35 = vector.broadcast %cst_16 : f32 to vector<8x8xf32>
    %36 = arith.select %33, %34, %35 : vector<8x8xi1>, vector<8x8xf32>
    %37 = vector.extract_strided_slice %30 {offsets = [0, 0, 0], sizes = [1, 8, 8], strides = [1, 1, 1]} : vector<1x8x96xf32> to vector<1x8x8xf32>
    %cst_17 = arith.constant 0.353553385 : f32
    %38 = vector.broadcast %cst_17 : f32 to vector<1x8x8xf32>
    %39 = arith.mulf %37, %38 : vector<1x8x8xf32>
    %40 = arith.truncf %39 : vector<1x8x8xf32> to vector<1x8x8xbf16>
    %41 = vector.extract_strided_slice %30 {offsets = [0, 0, 32], sizes = [1, 8, 8], strides = [1, 1, 1]} : vector<1x8x96xf32> to vector<1x8x8xf32>
    %42 = arith.truncf %41 : vector<1x8x8xf32> to vector<1x8x8xbf16>
    %43 = vector.extract_strided_slice %30 {offsets = [0, 0, 64], sizes = [1, 8, 8], strides = [1, 1, 1]} : vector<1x8x96xf32> to vector<1x8x8xf32>
    %44 = arith.truncf %43 : vector<1x8x8xf32> to vector<1x8x8xbf16>
    "tpu.trace_start"() <{level = 10 : i32, message = "rqd,rkd->rqk"}> : () -> ()
    %cst_18 = arith.constant dense<0.000000e+00> : vector<1x8x8xf32>
    %45 = tpu.matmul %40, %42, %cst_18 {dimension_numbers = #tpu.dot_dimension_numbers<[2], [2], [1], [1], [0, 0, 0, 1, 1, 1], [0], [0]>} : vector<1x8x8xbf16>, vector<1x8x8xbf16>, vector<1x8x8xf32> -> vector<1x8x8xf32>
    "tpu.trace_stop"() : () -> ()
    %46 = vector.shape_cast %36 : vector<8x8xf32> to vector<1x8x8xf32>
    %47 = arith.addf %45, %46 : vector<1x8x8xf32>
    %cst_19 = arith.constant dense<0xFF800000> : vector<1x8xf32>
    %48 = vector.multi_reduction <maximumf>, %47, %cst_19 [2] : vector<1x8x8xf32> to vector<1x8xf32>
    %49 = vector.shape_cast %48 : vector<1x8xf32> to vector<1x8x1xf32>
    %50 = vector.broadcast %49 : vector<1x8x1xf32> to vector<1x8x8xf32>
    %51 = arith.subf %47, %50 : vector<1x8x8xf32>
    %52 = math.exp %51 : vector<1x8x8xf32>
    %cst_20 = arith.constant dense<0.000000e+00> : vector<1x8xf32>
    %53 = vector.multi_reduction <add>, %52, %cst_20 [2] : vector<1x8x8xf32> to vector<1x8xf32>
    %54 = vector.shape_cast %53 : vector<1x8xf32> to vector<1x8x1xf32>
    %55 = tpu.reciprocal %54 {approx = true} : vector<1x8x1xf32> -> vector<1x8x1xf32>
    %56 = vector.broadcast %55 : vector<1x8x1xf32> to vector<1x8x8xf32>
    %57 = arith.mulf %52, %56 : vector<1x8x8xf32>
    %58 = arith.truncf %57 : vector<1x8x8xf32> to vector<1x8x8xbf16>
    "tpu.trace_start"() <{level = 10 : i32, message = "rqk,rkd->rqd"}> : () -> ()
    %cst_21 = arith.constant dense<0.000000e+00> : vector<1x8x8xf32>
    %59 = tpu.matmul %58, %44, %cst_21 {dimension_numbers = #tpu.dot_dimension_numbers<[2], [1], [1], [2], [0, 0, 0, 1, 1, 2], [0], [0]>} : vector<1x8x8xbf16>, vector<1x8x8xbf16>, vector<1x8x8xf32> -> vector<1x8x8xf32>
    "tpu.trace_stop"() : () -> ()
    %60 = arith.truncf %59 : vector<1x8x8xf32> to vector<1x8x8xbf16>
    %c0_22 = arith.constant 0 : index
    %c0_23 = arith.constant 0 : index
    %c0_24 = arith.constant 0 : index
    %61 = vector.load %arg9[%c0_22, %c0_23, %c0_24] : memref<1x8x32xbf16, #tpu.memory_space<vmem>>, vector<1x8x8xbf16>
    tpu.vector_store %arg9[%c0_22, %c0_23, %c0_24], %60 {strides = array<i32>} : memref<1x8x32xbf16, #tpu.memory_space<vmem>>, vector<1x8x8xbf16>,
    %62 = vector.extract_strided_slice %30 {offsets = [0, 0, 8], sizes = [1, 8, 8], strides = [1, 1, 1]} : vector<1x8x96xf32> to vector<1x8x8xf32>
    %cst_25 = arith.constant 0.353553385 : f32
    %63 = vector.broadcast %cst_25 : f32 to vector<1x8x8xf32>
    %64 = arith.mulf %62, %63 : vector<1x8x8xf32>
    %65 = arith.truncf %64 : vector<1x8x8xf32> to vector<1x8x8xbf16>
    %66 = vector.extract_strided_slice %30 {offsets = [0, 0, 40], sizes = [1, 8, 8], strides = [1, 1, 1]} : vector<1x8x96xf32> to vector<1x8x8xf32>
    %67 = arith.truncf %66 : vector<1x8x8xf32> to vector<1x8x8xbf16>
    %68 = vector.extract_strided_slice %30 {offsets = [0, 0, 72], sizes = [1, 8, 8], strides = [1, 1, 1]} : vector<1x8x96xf32> to vector<1x8x8xf32>
    %69 = arith.truncf %68 : vector<1x8x8xf32> to vector<1x8x8xbf16>
    "tpu.trace_start"() <{level = 10 : i32, message = "rqd,rkd->rqk"}> : () -> ()
    %cst_26 = arith.constant dense<0.000000e+00> : vector<1x8x8xf32>
    %70 = tpu.matmul %65, %67, %cst_26 {dimension_numbers = #tpu.dot_dimension_numbers<[2], [2], [1], [1], [0, 0, 0, 1, 1, 1], [0], [0]>} : vector<1x8x8xbf16>, vector<1x8x8xbf16>, vector<1x8x8xf32> -> vector<1x8x8xf32>
    "tpu.trace_stop"() : () -> ()
    %71 = vector.shape_cast %36 : vector<8x8xf32> to vector<1x8x8xf32>
    %72 = arith.addf %70, %71 : vector<1x8x8xf32>
    %cst_27 = arith.constant dense<0xFF800000> : vector<1x8xf32>
    %73 = vector.multi_reduction <maximumf>, %72, %cst_27 [2] : vector<1x8x8xf32> to vector<1x8xf32>
    %74 = vector.shape_cast %73 : vector<1x8xf32> to vector<1x8x1xf32>
    %75 = vector.broadcast %74 : vector<1x8x1xf32> to vector<1x8x8xf32>
    %76 = arith.subf %72, %75 : vector<1x8x8xf32>
    %77 = math.exp %76 : vector<1x8x8xf32>
    %cst_28 = arith.constant dense<0.000000e+00> : vector<1x8xf32>
    %78 = vector.multi_reduction <add>, %77, %cst_28 [2] : vector<1x8x8xf32> to vector<1x8xf32>
    %79 = vector.shape_cast %78 : vector<1x8xf32> to vector<1x8x1xf32>
    %80 = tpu.reciprocal %79 {approx = true} : vector<1x8x1xf32> -> vector<1x8x1xf32>
    %81 = vector.broadcast %80 : vector<1x8x1xf32> to vector<1x8x8xf32>
    %82 = arith.mulf %77, %81 : vector<1x8x8xf32>
    %83 = arith.truncf %82 : vector<1x8x8xf32> to vector<1x8x8xbf16>
    "tpu.trace_start"() <{level = 10 : i32, message = "rqk,rkd->rqd"}> : () -> ()
    %cst_29 = arith.constant dense<0.000000e+00> : vector<1x8x8xf32>
    %84 = tpu.matmul %83, %69, %cst_29 {dimension_numbers = #tpu.dot_dimension_numbers<[2], [1], [1], [2], [0, 0, 0, 1, 1, 2], [0], [0]>} : vector<1x8x8xbf16>, vector<1x8x8xbf16>, vector<1x8x8xf32> -> vector<1x8x8xf32>
    "tpu.trace_stop"() : () -> ()
    %85 = arith.truncf %84 : vector<1x8x8xf32> to vector<1x8x8xbf16>
    %c0_30 = arith.constant 0 : index
    %c0_31 = arith.constant 0 : index
    %c8 = arith.constant 8 : index
    %86 = vector.load %arg9[%c0_30, %c0_31, %c8] : memref<1x8x32xbf16, #tpu.memory_space<vmem>>, vector<1x8x8xbf16>
    tpu.vector_store %arg9[%c0_30, %c0_31, %c8], %85 {strides = array<i32>} : memref<1x8x32xbf16, #tpu.memory_space<vmem>>, vector<1x8x8xbf16>,
    %87 = vector.extract_strided_slice %30 {offsets = [0, 0, 16], sizes = [1, 8, 8], strides = [1, 1, 1]} : vector<1x8x96xf32> to vector<1x8x8xf32>
    %cst_32 = arith.constant 0.353553385 : f32
    %88 = vector.broadcast %cst_32 : f32 to vector<1x8x8xf32>
    %89 = arith.mulf %87, %88 : vector<1x8x8xf32>
    %90 = arith.truncf %89 : vector<1x8x8xf32> to vector<1x8x8xbf16>
    %91 = vector.extract_strided_slice %30 {offsets = [0, 0, 48], sizes = [1, 8, 8], strides = [1, 1, 1]} : vector<1x8x96xf32> to vector<1x8x8xf32>
    %92 = arith.truncf %91 : vector<1x8x8xf32> to vector<1x8x8xbf16>
    %93 = vector.extract_strided_slice %30 {offsets = [0, 0, 80], sizes = [1, 8, 8], strides = [1, 1, 1]} : vector<1x8x96xf32> to vector<1x8x8xf32>
    %94 = arith.truncf %93 : vector<1x8x8xf32> to vector<1x8x8xbf16>
    "tpu.trace_start"() <{level = 10 : i32, message = "rqd,rkd->rqk"}> : () -> ()
    %cst_33 = arith.constant dense<0.000000e+00> : vector<1x8x8xf32>
    %95 = tpu.matmul %90, %92, %cst_33 {dimension_numbers = #tpu.dot_dimension_numbers<[2], [2], [1], [1], [0, 0, 0, 1, 1, 1], [0], [0]>} : vector<1x8x8xbf16>, vector<1x8x8xbf16>, vector<1x8x8xf32> -> vector<1x8x8xf32>
    "tpu.trace_stop"() : () -> ()
    %96 = vector.shape_cast %36 : vector<8x8xf32> to vector<1x8x8xf32>
    %97 = arith.addf %95, %96 : vector<1x8x8xf32>
    %cst_34 = arith.constant dense<0xFF800000> : vector<1x8xf32>
    %98 = vector.multi_reduction <maximumf>, %97, %cst_34 [2] : vector<1x8x8xf32> to vector<1x8xf32>
    %99 = vector.shape_cast %98 : vector<1x8xf32> to vector<1x8x1xf32>
    %100 = vector.broadcast %99 : vector<1x8x1xf32> to vector<1x8x8xf32>
    %101 = arith.subf %97, %100 : vector<1x8x8xf32>
    %102 = math.exp %101 : vector<1x8x8xf32>
    %cst_35 = arith.constant dense<0.000000e+00> : vector<1x8xf32>
    %103 = vector.multi_reduction <add>, %102, %cst_35 [2] : vector<1x8x8xf32> to vector<1x8xf32>
    %104 = vector.shape_cast %103 : vector<1x8xf32> to vector<1x8x1xf32>
    %105 = tpu.reciprocal %104 {approx = true} : vector<1x8x1xf32> -> vector<1x8x1xf32>
    %106 = vector.broadcast %105 : vector<1x8x1xf32> to vector<1x8x8xf32>
    %107 = arith.mulf %102, %106 : vector<1x8x8xf32>
    %108 = arith.truncf %107 : vector<1x8x8xf32> to vector<1x8x8xbf16>
    "tpu.trace_start"() <{level = 10 : i32, message = "rqk,rkd->rqd"}> : () -> ()
    %cst_36 = arith.constant dense<0.000000e+00> : vector<1x8x8xf32>
    %109 = tpu.matmul %108, %94, %cst_36 {dimension_numbers = #tpu.dot_dimension_numbers<[2], [1], [1], [2], [0, 0, 0, 1, 1, 2], [0], [0]>} : vector<1x8x8xbf16>, vector<1x8x8xbf16>, vector<1x8x8xf32> -> vector<1x8x8xf32>
    "tpu.trace_stop"() : () -> ()
    %110 = arith.truncf %109 : vector<1x8x8xf32> to vector<1x8x8xbf16>
    %c0_37 = arith.constant 0 : index
    %c0_38 = arith.constant 0 : index
    %c16 = arith.constant 16 : index
    %111 = vector.load %arg9[%c0_37, %c0_38, %c16] : memref<1x8x32xbf16, #tpu.memory_space<vmem>>, vector<1x8x8xbf16>
    tpu.vector_store %arg9[%c0_37, %c0_38, %c16], %110 {strides = array<i32>} : memref<1x8x32xbf16, #tpu.memory_space<vmem>>, vector<1x8x8xbf16>,
    %112 = vector.extract_strided_slice %30 {offsets = [0, 0, 24], sizes = [1, 8, 8], strides = [1, 1, 1]} : vector<1x8x96xf32> to vector<1x8x8xf32>
    %cst_39 = arith.constant 0.353553385 : f32
    %113 = vector.broadcast %cst_39 : f32 to vector<1x8x8xf32>
    %114 = arith.mulf %112, %113 : vector<1x8x8xf32>
    %115 = arith.truncf %114 : vector<1x8x8xf32> to vector<1x8x8xbf16>
    %116 = vector.extract_strided_slice %30 {offsets = [0, 0, 56], sizes = [1, 8, 8], strides = [1, 1, 1]} : vector<1x8x96xf32> to vector<1x8x8xf32>
    %117 = arith.truncf %116 : vector<1x8x8xf32> to vector<1x8x8xbf16>
    %118 = vector.extract_strided_slice %30 {offsets = [0, 0, 88], sizes = [1, 8, 8], strides = [1, 1, 1]} : vector<1x8x96xf32> to vector<1x8x8xf32>
    %119 = arith.truncf %118 : vector<1x8x8xf32> to vector<1x8x8xbf16>
    "tpu.trace_start"() <{level = 10 : i32, message = "rqd,rkd->rqk"}> : () -> ()
    %cst_40 = arith.constant dense<0.000000e+00> : vector<1x8x8xf32>
    %120 = tpu.matmul %115, %117, %cst_40 {dimension_numbers = #tpu.dot_dimension_numbers<[2], [2], [1], [1], [0, 0, 0, 1, 1, 1], [0], [0]>} : vector<1x8x8xbf16>, vector<1x8x8xbf16>, vector<1x8x8xf32> -> vector<1x8x8xf32>
    "tpu.trace_stop"() : () -> ()
    %121 = vector.shape_cast %36 : vector<8x8xf32> to vector<1x8x8xf32>
    %122 = arith.addf %120, %121 : vector<1x8x8xf32>
    %cst_41 = arith.constant dense<0xFF800000> : vector<1x8xf32>
    %123 = vector.multi_reduction <maximumf>, %122, %cst_41 [2] : vector<1x8x8xf32> to vector<1x8xf32>
    %124 = vector.shape_cast %123 : vector<1x8xf32> to vector<1x8x1xf32>
    %125 = vector.broadcast %124 : vector<1x8x1xf32> to vector<1x8x8xf32>
    %126 = arith.subf %122, %125 : vector<1x8x8xf32>
    %127 = math.exp %126 : vector<1x8x8xf32>
    %cst_42 = arith.constant dense<0.000000e+00> : vector<1x8xf32>
    %128 = vector.multi_reduction <add>, %127, %cst_42 [2] : vector<1x8x8xf32> to vector<1x8xf32>
    %129 = vector.shape_cast %128 : vector<1x8xf32> to vector<1x8x1xf32>
    %130 = tpu.reciprocal %129 {approx = true} : vector<1x8x1xf32> -> vector<1x8x1xf32>
    %131 = vector.broadcast %130 : vector<1x8x1xf32> to vector<1x8x8xf32>
    %132 = arith.mulf %127, %131 : vector<1x8x8xf32>
    %133 = arith.truncf %132 : vector<1x8x8xf32> to vector<1x8x8xbf16>
    "tpu.trace_start"() <{level = 10 : i32, message = "rqk,rkd->rqd"}> : () -> ()
    %cst_43 = arith.constant dense<0.000000e+00> : vector<1x8x8xf32>
    %134 = tpu.matmul %133, %119, %cst_43 {dimension_numbers = #tpu.dot_dimension_numbers<[2], [1], [1], [2], [0, 0, 0, 1, 1, 2], [0], [0]>} : vector<1x8x8xbf16>, vector<1x8x8xbf16>, vector<1x8x8xf32> -> vector<1x8x8xf32>
    "tpu.trace_stop"() : () -> ()
    %135 = arith.truncf %134 : vector<1x8x8xf32> to vector<1x8x8xbf16>
    %c0_44 = arith.constant 0 : index
    %c0_45 = arith.constant 0 : index
    %c24 = arith.constant 24 : index
    %136 = vector.load %arg9[%c0_44, %c0_45, %c24] : memref<1x8x32xbf16, #tpu.memory_space<vmem>>, vector<1x8x8xbf16>
    tpu.vector_store %arg9[%c0_44, %c0_45, %c24], %135 {strides = array<i32>} : memref<1x8x32xbf16, #tpu.memory_space<vmem>>, vector<1x8x8xbf16>,
    %c0_46 = arith.constant 0 : index
    %c0_47 = arith.constant 0 : index
    %c0_48 = arith.constant 0 : index
    %137 = vector.load %arg9[%c0_46, %c0_47, %c0_48] : memref<1x8x32xbf16, #tpu.memory_space<vmem>>, vector<1x8x32xbf16>
    %138 = vector.shape_cast %137 : vector<1x8x32xbf16> to vector<8x32xbf16>
    %c0_49 = arith.constant 0 : index
    %c0_50 = arith.constant 0 : index
    %139 = vector.load %arg6[%c0_49, %c0_50] : memref<32x32xbf16, #tpu.memory_space<vmem>>, vector<32x32xbf16>
    %cst_51 = arith.constant dense<0.000000e+00> : vector<8x32xf32>
    %140 = tpu.matmul %138, %139, %cst_51 {dimension_numbers = #tpu.dot_dimension_numbers<[1], [0], [0], [1], [0, 0, 1, 1], [], []>} : vector<8x32xbf16>, vector<32x32xbf16>, vector<8x32xf32> -> vector<8x32xf32>
    %c0_52 = arith.constant 0 : index
    %c0_53 = arith.constant 0 : index
    %141 = vector.load %arg7[%c0_52, %c0_53] : memref<1x32xf32, #tpu.memory_space<vmem>>, vector<1x32xf32>
    %142 = vector.broadcast %141 : vector<1x32xf32> to vector<8x32xf32>
    %143 = arith.addf %140, %142 : vector<8x32xf32>
    %144 = vector.shape_cast %143 : vector<8x32xf32> to vector<1x8x32xf32>
    %145 = arith.addf %0, %144 : vector<1x8x32xf32>
    %c0_54 = arith.constant 0 : index
    %c0_55 = arith.constant 0 : index
    %c0_56 = arith.constant 0 : index
    %146 = vector.load %arg8[%c0_54, %c0_55, %c0_56] : memref<1x8x32xf32, #tpu.memory_space<vmem>>, vector<1x8x32xf32>
    tpu.vector_store %arg8[%c0_54, %c0_55, %c0_56], %145 {strides = array<i32>} : memref<1x8x32xf32, #tpu.memory_space<vmem>>, vector<1x8x32xf32>,
    return
  }
  func.func @transform_0(%arg0: i32) -> (i32, i32, i32) {
    %c0_i32 = arith.constant 0 : i32
    %c0_i32_0 = arith.constant 0 : i32
    %c0_i32_1 = arith.constant 0 : i32
    return %arg0, %c0_i32, %c0_i32_0 : i32, i32, i32
  }
  func.func @transform_1(%arg0: i32) -> (i32, i32) {
    %c0_i32 = arith.constant 0 : i32
    %c0_i32_0 = arith.constant 0 : i32
    %c0_i32_1 = arith.constant 0 : i32
    return %c0_i32, %c0_i32_0 : i32, i32
  }
  func.func @transform_2(%arg0: i32) -> (i32, i32) {
    %c0_i32 = arith.constant 0 : i32
    %c0_i32_0 = arith.constant 0 : i32
    %c0_i32_1 = arith.constant 0 : i32
    return %c0_i32, %c0_i32_0 : i32, i32
  }
  func.func @transform_3(%arg0: i32) -> (i32, i32) {
    %c0_i32 = arith.constant 0 : i32
    %c0_i32_0 = arith.constant 0 : i32
    %c0_i32_1 = arith.constant 0 : i32
    return %c0_i32, %c0_i32_0 : i32, i32
  }
  func.func @transform_4(%arg0: i32) -> (i32, i32) {
    %c0_i32 = arith.constant 0 : i32
    %c0_i32_0 = arith.constant 0 : i32
    %c0_i32_1 = arith.constant 0 : i32
    return %c0_i32, %c0_i32_0 : i32, i32
  }
  func.func @transform_5(%arg0: i32) -> (i32, i32) {
    %c0_i32 = arith.constant 0 : i32
    %c0_i32_0 = arith.constant 0 : i32
    %c0_i32_1 = arith.constant 0 : i32
    return %c0_i32, %c0_i32_0 : i32, i32
  }
  func.func @transform_6(%arg0: i32) -> (i32, i32) {
    %c0_i32 = arith.constant 0 : i32
    %c0_i32_0 = arith.constant 0 : i32
    %c0_i32_1 = arith.constant 0 : i32
    return %c0_i32, %c0_i32_0 : i32, i32
  }
  func.func @transform_7(%arg0: i32) -> (i32, i32, i32) {
    %c0_i32 = arith.constant 0 : i32
    %c0_i32_0 = arith.constant 0 : i32
    %c0_i32_1 = arith.constant 0 : i32
    return %arg0, %c0_i32, %c0_i32_0 : i32, i32, i32
  }
}

</mosaic_0001>

<bundles_post_ra>
// kernel: text_encoder_forward.5
= control target key start
LH: loop header
LB: loop body
LE: loop exit
PB: predicated region body
PF: predicated region fallthrough
CT: control target
= control target key end

     0   :  { %s690_s24 = smov 0   ;;  %s765_s0 = inlined_call_operand.vmem [shape: f32[2,8,32], index: 0, kind: input, shape index: {}]   ;;  %s766_s1 = inlined_call_operand.vmem [shape: f32[1,32], index: 1, kind: input, shape index: {}]   ;;  %s767_s2 = inlined_call_operand.vmem [shape: f32[1,32], index: 2, kind: input, shape index: {}]   ;;  %s768_s3 = inlined_call_operand.vmem [shape: bf16[32,128], index: 3, kind: input, shape index: {}]   ;;  %s769_s4 = inlined_call_operand.vmem [shape: f32[1,128], index: 4, kind: input, shape index: {}]   ;;  %s770_s5 = inlined_call_operand.vmem [shape: bf16[128,32], index: 5, kind: input, shape index: {}]   ;;  %s771_s6 = inlined_call_operand.vmem [shape: f32[1,32], index: 6, kind: input, shape index: {}]   ;;  %s772_s7 = inlined_call_operand.vmem [shape: f32[2,8,32], index: 7, kind: output, shape index: {}]  }
   0x1 LB: > { %s549_s25 = sadd.s32 4294967295, %s646_s24   ;;  %p553_p0 = scmp.ge.s32.totalorder %s646_s24, 1  ;;  %s646_s24 = sphi %s690_s24, %s17_s24  }
   0x2   : > { %p236_p1 = scmp.lt.s32.totalorder %s646_s24, 3 }
   0x4   : > { %p237_p2 = pnand %p553_p0, %p236_p1 }
   0x5   : > { %p266_p3 = scmp.lt.s32.totalorder (!%p237_p2), %s549_s25, 1 }
   0x6   : > { %240 = sbr.rel (%p237_p2) target bundleno = 757 (0x2f5), region = 48 }
   0xb   : > { %s774_s25 = smov (!%p266_p3, %s549_s25), 1  ;;  %vm278_vm0 = vcmask 261120   ;;  %v624_v7 = vld [vmem:[%s768_s3 + $0x8] sm:$0xff]   ;;  %v648_v8 = vmov 0.0   ;;  %vm649_vm1 = vmmov 0   ;;  %v625_v9 = vld [vmem:[%s768_s3] sm:$0xff]  }
   0xc   : > { %s554_s26 = sshll.u32 %s774_s25, 3  ;;  %586 = vmatprep.subr.bf16.mxu0 %v648_v8  ;;  %590 = vmatprep.mubr.msk.bf16.mxu0 %vm649_vm1, %v648_v8  ;;  %v556_v14 = vld [vmem:[%s766_s1] ss:$0 sm:$0xff]  ;;  %v626_v20 = vld [vmem:[%s770_s5 + $0x38] sm:$0xff]   ;;  %v627_v21 = vld [vmem:[%s770_s5 + $0x30] sm:$0xff]  }
   0xd   : > { %s269_s29 = scalar_lea.vmem %s765_s0, %s554_s26  ;;  %587 = vmatpush3.bf16.msra.mxu0 %v624_v7  ;;  %594 = vmatprep.subr.bf16.mxu1 %v648_v8  ;;  %v557_v16 = vld [vmem:[%s767_s2] ss:$0 sm:$0xff]  ;;  %v628_v22 = vld [vmem:[%s770_s5 + $0x28] sm:$0xff]   ;;  %v630_v24 = vld [vmem:[%s770_s5 + $0x18] sm:$0xff]   ;;  %s273_s17 = scalar_lea.vmem %s772_s7, %s554_s26 }
   0xe   : > { %v706_v0 = vld [vmem:[%s269_s29] sm:$0xff]  ;;  %588 = vmatprep.subr.bf16.mxu0 %v648_v8  ;;  %610 = vmatprep.mubr.msk.bf16.mxu1 %vm649_vm1, %v648_v8  ;;  %v631_v25 = vld [vmem:[%s770_s5 + $0x10] sm:$0xff]   ;;  %v632_v26 = vld [vmem:[%s770_s5 + $0x8] sm:$0xff]  }
   0xf   : > { %v279_v1 = vsel %vm278_vm0, %v706_v0, 0.0  ;;  %595 = vmatpush3.bf16.msra.mxu1 %v626_v20  ;;  %v629_v23 = vld [vmem:[%s770_s5 + $0x20] sm:$0xff]  }
  0x10   : > { %280 = vadd.xlane.f32.xlu0 %v279_v1  ;;  %596 = vmatprep.subr.bf16.mxu1 %v648_v8  ;;  %v633_v27 = vld [vmem:[%s770_s5] sm:$0xff]  }
  0x11   : > { %589 = vmatpush3.bf16.msra.mxu0 %v625_v9  ;;  %v558_v28 = vld [vmem:[%s769_s4] ss:$0 sm:$0xff] }
  0x12   : > { %v563_v41 = vld [vmem:[%s771_s6] ss:$0 sm:$0xff] }
  0x13   : > { %597 = vmatpush3.bf16.msra.mxu1 %v627_v21 }
  0x14   : > { %598 = vmatprep.subr.bf16.mxu1 %v648_v8 }
  0x17   : > { %599 = vmatpush3.bf16.msra.mxu1 %v628_v22 }
  0x18   : > { %600 = vmatprep.subr.bf16.mxu1 %v648_v8 }
  0x1b   : > { %601 = vmatpush3.bf16.msra.mxu1 %v629_v23 }
  0x1c   : > { %602 = vmatprep.subr.bf16.mxu1 %v648_v8 }
  0x1f   : > { %603 = vmatpush3.bf16.msra.mxu1 %v630_v24 }
  0x20   : > { %604 = vmatprep.subr.bf16.mxu1 %v648_v8 }
  0x23   : > { %605 = vmatpush3.bf16.msra.mxu1 %v631_v25 }
  0x24   : > { %606 = vmatprep.subr.bf16.mxu1 %v648_v8 }
  0x27   : > { %607 = vmatpush3.bf16.msra.mxu1 %v632_v26 }
  0x28   : > { %608 = vmatprep.subr.bf16.mxu1 %v648_v8 }
  0x2b   : > { %609 = vmatpush3.bf16.msra.mxu1 %v633_v27 }
  0x99   : > { %v281_v2 = vpop.xlane.xlu0 %280 }
  0x9a   : > { %v283_v3 = vmul.f32 0.03125, %v281_v2 }
  0x9c   : > { %v284_v4 = vsub.f32 %v706_v0, %v283_v3 }
  0x9e   : > { %v285_v5 = vmul.f32 %v284_v4, %v284_v4 }
  0xa0   : > { %v286_v6 = vsel %vm278_vm0, %v285_v5, 0.0 }
  0xa1   : > { %287 = vadd.xlane.f32.xlu0 %v286_v6 }
 0x12a   : > { %v288_v10 = vpop.xlane.xlu0 %287 }
 0x12b   : > { %v289_v11 = vmul.f32 0.03125, %v288_v10 }
 0x12d   : > { %v290_v12 = vadd.f32 1e-05, %v289_v11 }
 0x12f   : > { %634 = vrsqrt.f32 %v290_v12 }
 0x13c   : > { %v635_v13 = vpop.eup %634 }
 0x13d   : > { %v292_v15 = vmul.f32 %v635_v13, %v284_v4 }
 0x13f   : > { %v299_v17 = vmul.f32 %v556_v14, %v292_v15 }
 0x141   : > { %v306_v18 = vadd.f32 %v557_v16, %v299_v17 }
 0x143   : > { %v307_v19 = vpack.c.bf16 %v306_v18, %v306_v18 }
 0x145   : > { %591 = vmatmul.mubr.msk.bf16.vlgmr.msra.gmra.mxu0 %vm278_vm0, %v307_v19 }
 0x205   : > { %v368_v29 = vpop.f32.mrf.mxu0 }
 0x206   : > { %v369_v30 = vadd.f32 %v558_v28, %v368_v29 }
 0x207   : > { %v592_v31 = vpop.f32.mrf.mxu0 }
 0x208   : > { %v562_v32 = vmul.f32 -1.702, %v369_v30 }
 0x209   : > { %v371_v33 = vpop.f32.mrf.mxu0 }
 0x20a   : > { %v376_v34 = vmul.f32 1.442695, %v562_v32 }
 0x20b   : > { %v593_v35 = vpop.f32.mrf.mxu0 }
 0x20c   : > { %636 = vpow2.f32 %v376_v34 }
 0x219   : > { %v637_v36 = vpop.eup %636 }
 0x21a   : > { %v378_v37 = vadd.f32 1.0, %v637_v36 }
 0x21c   : > { %638 = vrcp.f32 %v378_v37 }
 0x229   : > { %v639_v38 = vpop.eup %638 }
 0x22a   : > { %v381_v39 = vmul.f32 %v639_v38, %v369_v30 }
 0x22c   : > { %v382_v40 = vpack.c.bf16 %v381_v39, %v381_v39 }
 0x22e   : > { %611 = vmatmul.mubr.bf16.vlgmr.msra.gmra.mxu1 %v382_v40 }
 0x2ee   : > { %v488_v42 = vpop.f32.mrf.mxu1 }
 0x2ef   : > { %v489_v43 = vadd.f32 %v563_v41, %v488_v42 }
 0x2f0   : > { %v612_v44 = vpop.f32.mrf.mxu1 }
 0x2f1   : > { %v494_v45 = vadd.f32 %v489_v43, %v706_v0 }
 0x2f2   : > { %v491_v46 = vpop.f32.mrf.mxu1 }
 0x2f3   : > { %495 = vst.msk [vmem:[%s273_s17] sm:$0xff] %vm278_vm0, %v494_v45 }
 0x2f4   : > { %v613_v47 = vpop.f32.mrf.mxu1 }
 0x2f5 PF: > { %s17_s24 = sadd.s32 1, %s646_s24  }
 0x2f6   : > { %p14_p4 = scmp.ge.s32.totalorder %s17_s24, 4  }
 0x2f8   :  { %16 = sbr.rel (!%p14_p4) target bundleno = 1 (0x1), region = 78 }

// kernel: text_encoder_forward.4
= control target key start
LH: loop header
LB: loop body
LE: loop exit
PB: predicated region body
PF: predicated region fallthrough
CT: control target
= control target key end

     0   :  { %s1208_s24 = smov 0   ;;  %s1332_s0 = inlined_call_operand.vmem [shape: f32[2,8,32], index: 0, kind: input, shape index: {}]   ;;  %s1333_s1 = inlined_call_operand.vmem [shape: f32[1,32], index: 1, kind: input, shape index: {}]   ;;  %s1334_s2 = inlined_call_operand.vmem [shape: f32[1,32], index: 2, kind: input, shape index: {}]   ;;  %s1335_s3 = inlined_call_operand.vmem [shape: bf16[32,96], index: 3, kind: input, shape index: {}]   ;;  %s1336_s4 = inlined_call_operand.vmem [shape: f32[1,96], index: 4, kind: input, shape index: {}]   ;;  %s1337_s5 = inlined_call_operand.vmem [shape: bf16[32,32], index: 5, kind: input, shape index: {}]   ;;  %s1338_s6 = inlined_call_operand.vmem [shape: f32[1,32], index: 6, kind: input, shape index: {}]   ;;  %s1339_s7 = inlined_call_operand.vmem [shape: f32[2,8,32], index: 7, kind: output, shape index: {}]  }
   0x1 LB: > { %s977_s25 = sadd.s32 4294967295, %s1149_s24   ;;  %p981_p0 = scmp.ge.s32.totalorder %s1149_s24, 1  ;;  %s1149_s24 = sphi %s1208_s24, %s17_s24  }
   0x2   : > { %p236_p1 = scmp.lt.s32.totalorder %s1149_s24, 3 }
   0x4   : > { %p237_p2 = pnand %p981_p0, %p236_p1 }
   0x5   : > { %p266_p3 = scmp.lt.s32.totalorder (!%p237_p2), %s977_s25, 1  ;;  %s1153_s17 = smov (!%p237_p2), 96  }
   0x6   : > { %240 = sbr.rel (%p237_p2) target bundleno = 1732 (0x6c4), region = 48  ;;  %s1154_s18 = smov (!%p237_p2), 120  }
   0x7   : > { %s1155_s19 = smov (!%p237_p2), 88   ;;  %s1156_s20 = smov (!%p237_p2), 80  }
   0x8   : > { %s1157_s21 = smov (!%p237_p2), 112   ;;  %s1158_s22 = smov (!%p237_p2), 72  }
   0x9   : > { %s1159_s23 = smov (!%p237_p2), 104   ;;  %s1161_s27 = smov (!%p237_p2), 64  }
   0xa   : > { %s1162_s28 = smov (!%p237_p2), 56   ;;  %s1164_s30 = smov (!%p237_p2), 40  }
   0xb   : > { %s1341_s25 = smov (!%p266_p3, %s977_s25), 1  ;;  %vm278_vm0 = vcmask 261120   ;;  %v1121_v7 = vld [vmem:[%s1335_s3 + $0x8] sm:$0xff]   ;;  %v1151_v8 = vmov 0.0   ;;  %vm1152_vm1 = vmmov 0   ;;  %v1122_v9 = vld [vmem:[%s1335_s3] sm:$0xff]   ;;  %v374_v40 = vlaneseq }
   0xc   : > { %s982_s26 = sshll.u32 %s1341_s25, 3  ;;  %1032 = vmatprep.subr.bf16.mxu0 %v1151_v8  ;;  %1036 = vmatprep.mubr.msk.bf16.mxu0 %vm1152_vm1, %v1151_v8  ;;  %v984_v14 = vld [vmem:[%s1333_s1] ss:$0 sm:$0xff]  ;;  %vm386_vm2 = vcmask 64512   ;;  %v1160_v43 = vmov -1e+09  }
   0xd   : > { %s269_s29 = scalar_lea.vmem %s1332_s0, %s982_s26  ;;  %1033 = vmatpush3.bf16.msra.mxu0 %v1121_v7  ;;  %1040 = vmatprep.subr.bf16.mxu1 %v1151_v8  ;;  %v985_v16 = vld [vmem:[%s1334_s2] ss:$0 sm:$0xff]  ;;  %v375_v41 = vshrl.u32 %v374_v40, 7  ;;  %v377_v42 = vand.u32 127, %v374_v40  ;;  %vm450_vm4 = vcmask 1043456   ;;  %vm495_vm5 = vcmask 60416  }
   0xe   : > { %v1224_v0 = vld [vmem:[%s269_s29] sm:$0xff]  ;;  %1034 = vmatprep.subr.bf16.mxu0 %v1151_v8  ;;  %1042 = vmatprep.mubr.msk.bf16.mxu1 %vm1152_vm1, %v1151_v8  ;;  %s1163_s29 = smov 48   ;;  %s1165_s8 = smov 8   ;;  %vm615_vm6 = vcmask 126016   ;;  %vm734_vm7 = vcmask 191616   ;;  %vm853_vm8 = vcmask 257216  }
   0xf   : > { %v279_v1 = vsel %vm278_vm0, %v1224_v0, 0.0  ;;  %v986_v20 = vld [vmem:[%s1336_s4] ss:$0 sm:$0xff]  ;;  %vm378_vm3 = vcmp.ge.s32.totalorder %v375_v41, %v377_v42  ;;  %s1166_s13 = smov 16   ;;  %s1167_s14 = smov 24  }
  0x10   : > { %280 = vadd.xlane.f32.xlu0 %v279_v1  ;;  %v379_v44 = vsel %vm378_vm3, 0.0, %v1160_v43 }
  0x11   : > { %1035 = vmatpush3.bf16.msra.mxu0 %v1122_v9 }
  0x12   : > { %1046 = vmatprep.subr.bf16.mxu0 %v1151_v8 }
  0x99   : > { %v281_v2 = vpop.xlane.xlu0 %280 }
  0x9a   : > { %v283_v3 = vmul.f32 0.03125, %v281_v2 }
  0x9c   : > { %v284_v4 = vsub.f32 %v1224_v0, %v283_v3 }
  0x9e   : > { %v285_v5 = vmul.f32 %v284_v4, %v284_v4 }
  0xa0   : > { %v286_v6 = vsel %vm278_vm0, %v285_v5, 0.0 }
  0xa1   : > { %287 = vadd.xlane.f32.xlu0 %v286_v6 }
 0x12a   : > { %v288_v10 = vpop.xlane.xlu0 %287 }
 0x12b   : > { %v289_v11 = vmul.f32 0.03125, %v288_v10 }
 0x12d   : > { %v290_v12 = vadd.f32 1e-05, %v289_v11 }
 0x12f   : > { %1125 = vrsqrt.f32 %v290_v12 }
 0x13c   : > { %v1126_v13 = vpop.eup %1125 }
 0x13d   : > { %v292_v15 = vmul.f32 %v1126_v13, %v284_v4 }
 0x13f   : > { %v299_v17 = vmul.f32 %v984_v14, %v292_v15 }
 0x141   : > { %v306_v18 = vadd.f32 %v985_v16, %v299_v17 }
 0x143   : > { %v307_v19 = vpack.c.bf16 %v306_v18, %v306_v18 }
 0x145   : > { %1037 = vmatmul.mubr.msk.bf16.vlgmr.msra.gmra.mxu0 %vm278_vm0, %v307_v19 }
 0x146   : > { %1048 = vmatprep.mubr.msk.bf16.mxu0 %vm1152_vm1, %v1151_v8 }
 0x205   : > { %v368_v21 = vpop.f32.mrf.mxu0 }
 0x206   : > { %v369_v22 = vadd.f32 %v986_v20, %v368_v21 }
 0x207   : > { %v1038_v23 = vpop.f32.mrf.mxu0 }
 0x208   : > { %v380_v24 = vmul.f32 0.35355338, %v369_v22  ;;  %v1256_v25 = vpack.c.bf16 %v369_v22, %v369_v22 }
 0x209   : > { %v371_v26 = vpop.f32.mrf.mxu0 }
 0x20a   : > { %v381_v27 = vpack.c.bf16 %v380_v24, %v380_v24  ;;  %384 = vrot.lane.b32.xlu1 %v1256_v25, %s1153_s17 }
 0x20b   : > { %v1039_v28 = vpop.f32.mrf.mxu0 }
 0x20c   : > { %498 = vrot.lane.b32.xlu0 %v381_v27, %s1154_s18 }
 0x20e   : > { %500 = vrot.lane.b32.xlu1 %v1256_v25, %s1155_s19  ;;  %s273_s19 = scalar_lea.vmem %s1339_s7, %s982_s26 }
 0x212   : > { %619 = vrot.lane.b32.xlu1 %v1256_v25, %s1156_s20 }
 0x216   : > { %617 = vrot.lane.b32.xlu1 %v381_v27, %s1157_s21 }
 0x21a   : > { %738 = vrot.lane.b32.xlu1 %v1256_v25, %s1158_s22 }
 0x21e   : > { %736 = vrot.lane.b32.xlu1 %v381_v27, %s1159_s23 }
 0x27c   : > { %v385_v29 = vpop.permute.xlu1 %384 }
 0x27d   : > { %v391_v30 = vsel %vm386_vm2, %v385_v29, 0 }
 0x27e   : > { %1041 = vmatpush3.bf16.xpose.msra.mxu1 %v391_v30  ;;  %v499_v34 = vpop.permute.xlu0 %498 }
 0x27f   : > { %1052 = vmatprep.subr.bf16.mxu1 %v1151_v8 }
 0x280   : > { %v501_v31 = vpop.permute.xlu1 %500 }
 0x281   : > { %v506_v32 = vsel %vm386_vm2, %v501_v31, 0 }
 0x284   : > { %v620_v33 = vpop.permute.xlu1 %619 }
 0x285   : > { %1043 = vmatmul.mubr.msk.bf16.vlgmr.msra.gmra.mxu1 %vm386_vm2, %v381_v27  ;;  %v625_v36 = vsel %vm386_vm2, %v620_v33, 0 }
 0x286   : > { %1053 = vmatpush3.bf16.xpose.msra.mxu1 %v506_v32  ;;  %1054 = vmatprep.mubr.msk.bf16.mxu1 %vm1152_vm1, %v1151_v8 }
 0x287   : > { %1064 = vmatprep.subr.bf16.mxu1 %v1151_v8 }
 0x288   : > { %v618_v35 = vpop.permute.xlu1 %617 }
 0x28c   : > { %v739_v37 = vpop.permute.xlu1 %738 }
 0x28d   : > { %1055 = vmatmul.mubr.msk.bf16.vlgmr.msra.gmra.mxu1 %vm386_vm2, %v499_v34  ;;  %v744_v38 = vsel %vm386_vm2, %v739_v37, 0 }
 0x28e   : > { %1065 = vmatpush3.bf16.xpose.msra.mxu1 %v625_v36  ;;  %1066 = vmatprep.mubr.msk.bf16.mxu1 %vm1152_vm1, %v1151_v8 }
 0x28f   : > { %1076 = vmatprep.subr.bf16.mxu1 %v1151_v8 }
 0x290   : > { %v737_v39 = vpop.permute.xlu1 %736 }
 0x295   : > { %1067 = vmatmul.mubr.msk.bf16.vlgmr.msra.gmra.mxu1 %vm386_vm2, %v618_v35 }
 0x296   : > { %1077 = vmatpush3.bf16.xpose.msra.mxu1 %v744_v38  ;;  %1078 = vmatprep.mubr.msk.bf16.mxu1 %vm1152_vm1, %v1151_v8 }
 0x297   : > { %1088 = vmatprep.subr.bf16.mxu1 %v1151_v8 }
 0x29d   : > { %1079 = vmatmul.mubr.msk.bf16.vlgmr.msra.gmra.mxu1 %vm386_vm2, %v737_v39 }
 0x29e   : > { %1092 = vmatprep.mubr.msk.bf16.mxu1 %vm1152_vm1, %v1151_v8 }
 0x345   : > { %v427_v45 = vpop.f32.mrf.mxu1 }
 0x346   : > { %v428_v46 = vadd.f32 %v427_v45, %v379_v44 }
 0x347   : > { %v1044_v47 = vpop.f32.mrf.mxu1 }
 0x348   : > { %v433_v48 = vsel %vm386_vm2, %v428_v46, -inf }
 0x349   : > { %434 = vmax.xlane.f32.xlu1 %v433_v48  ;;  %v430_v49 = vpop.f32.mrf.mxu1 }
 0x34b   : > { %v1045_v50 = vpop.f32.mrf.mxu1 }
 0x34d   : > { %v542_v51 = vpop.f32.mrf.mxu1 }
 0x34e   : > { %v543_v52 = vadd.f32 %v542_v51, %v379_v44 }
 0x34f   : > { %v1056_v53 = vpop.f32.mrf.mxu1 }
 0x350   : > { %v548_v54 = vsel %vm386_vm2, %v543_v52, -inf }
 0x351   : > { %549 = vmax.xlane.f32.xlu0 %v548_v54  ;;  %v545_v55 = vpop.f32.mrf.mxu1 }
 0x353   : > { %v1057_v56 = vpop.f32.mrf.mxu1 }
 0x355   : > { %v661_v57 = vpop.f32.mrf.mxu1 }
 0x356   : > { %v662_v58 = vadd.f32 %v661_v57, %v379_v44 }
 0x357   : > { %v1068_v59 = vpop.f32.mrf.mxu1 }
 0x358   : > { %v667_v60 = vsel %vm386_vm2, %v662_v58, -inf }
 0x359   : > { %668 = vmax.xlane.f32.xlu1 %v667_v60  ;;  %v664_v61 = vpop.f32.mrf.mxu1 }
 0x35a   : > { %v1123_v61 = vld [vmem:[%s1337_s5 + $0x8] sm:$0xff]  }
 0x35b   : > { %v1069_v62 = vpop.f32.mrf.mxu1  ;;  %1089 = vmatpush3.bf16.msra.mxu1 %v1123_v61 }
 0x35c   : > { %1090 = vmatprep.subr.bf16.mxu1 %v1151_v8 }
 0x35d   : > { %v780_v63 = vpop.f32.mrf.mxu1 }
 0x35e   : > { %v781_v1 = vadd.f32 %v780_v63, %v379_v44  ;;  %v1124_v63 = vld [vmem:[%s1337_s5] sm:$0xff]  }
 0x35f   : > { %v1080_v2 = vpop.f32.mrf.mxu1  ;;  %1091 = vmatpush3.bf16.msra.mxu1 %v1124_v63 }
 0x360   : > { %v786_v3 = vsel %vm386_vm2, %v781_v1, -inf }
 0x361   : > { %787 = vmax.xlane.f32.xlu0 %v786_v3  ;;  %v783_v4 = vpop.f32.mrf.mxu1 }
 0x363   : > { %v1081_v5 = vpop.f32.mrf.mxu1 }
 0x3d2   : > { %v435_v6 = vpop.xlane.xlu1 %434 }
 0x3d3   : > { %v436_v7 = vsub.f32 %v428_v46, %v435_v6 }
 0x3d5   : > { %v437_v9 = vmul.f32 1.442695, %v436_v7 }
 0x3d7   : > { %1127 = vpow2.f32 %v437_v9 }
 0x3da   : > { %v550_v10 = vpop.xlane.xlu0 %549 }
 0x3db   : > { %v551_v11 = vsub.f32 %v543_v52, %v550_v10 }
 0x3dd   : > { %v552_v12 = vmul.f32 1.442695, %v551_v11 }
 0x3df   : > { %1129 = vpow2.f32 %v552_v12 }
 0x3e2   : > { %v669_v22 = vpop.xlane.xlu1 %668 }
 0x3e3   : > { %v670_v23 = vsub.f32 %v662_v58, %v669_v22 }
 0x3e4   : > { %v1128_v13 = vpop.eup %1127 }
 0x3e5   : > { %v439_v14 = vsel %vm386_vm2, %v1128_v13, 0.0  ;;  %v671_v24 = vmul.f32 1.442695, %v670_v23 }
 0x3e6   : > { %440 = vadd.xlane.f32.xlu1 %v439_v14  ;;  %v1001_v14 = vld [vmem:[%s1338_s6] ss:$0 sm:$0xff] }
 0x3ea   : > { %v788_v15 = vpop.xlane.xlu0 %787 }
 0x3eb   : > { %v789_v16 = vsub.f32 %v781_v1, %v788_v15 }
 0x3ec   : > { %v1130_v17 = vpop.eup %1129 }
 0x3ed   : > { %v790_v18 = vmul.f32 1.442695, %v789_v16  ;;  %v554_v19 = vsel %vm386_vm2, %v1130_v17, 0.0 }
 0x3ee   : > { %555 = vadd.xlane.f32.xlu0 %v554_v19 }
 0x3ef   : > { %1131 = vpow2.f32 %v790_v18 }
 0x3f0   : > { %1133 = vpow2.f32 %v671_v24 }
 0x3f7   : > { %445 = vrot.lane.b32.xlu1 %v1256_v25, %s1161_s27 }
 0x3fc   : > { %v1132_v20 = vpop.eup %1131 }
 0x3fd   : > { %v792_v21 = vsel %vm386_vm2, %v1132_v20, 0.0  ;;  %v1134_v26 = vpop.eup %1133 }
 0x3fe   : > { %793 = vadd.xlane.f32.xlu0 %v792_v21  ;;  %v673_v27 = vsel %vm386_vm2, %v1134_v26, 0.0 }
 0x414   : > { %560 = vrot.lane.b32.xlu0 %v1256_v25, %s1162_s28 }
 0x41b   : > { %674 = vadd.xlane.f32.xlu1 %v673_v27 }
 0x42c   : > { %679 = vrot.lane.b32.xlu1 %v1256_v25, %s1163_s29 }
 0x430   : > { %798 = vrot.lane.b32.xlu1 %v1256_v25, %s1164_s30 }
 0x46f   : > { %v441_v28 = vpop.xlane.xlu1 %440 }
 0x470   : > { %1135 = vrcp.f32 %v441_v28 }
 0x473   : > { %v446_v29 = vpop.permute.xlu1 %445 }
 0x474   : > { %v452_v30 = vsel %vm450_vm4, %v446_v29, 0 }
 0x475   : > { %1047 = vmatpush3.bf16.msra.mxu0 %v452_v30 }
 0x476   : > { %1058 = vmatprep.subr.bf16.mxu0 %v1151_v8 }
 0x477   : > { %v556_v31 = vpop.xlane.xlu0 %555 }
 0x478   : > { %1137 = vrcp.f32 %v556_v31 }
 0x47d   : > { %v1136_v32 = vpop.eup %1135 }
 0x47e   : > { %v443_v33 = vmul.f32 %v1136_v32, %v1128_v13 }
 0x480   : > { %v444_v34 = vpack.c.bf16 %v443_v33, %v443_v33 }
 0x482   : > { %1049 = vmatmul.mubr.msk.bf16.vlgmr.msra.gmra.mxu0 %vm386_vm2, %v444_v34 }
 0x483   : > { %1060 = vmatprep.mubr.msk.bf16.mxu0 %vm1152_vm1, %v1151_v8 }
 0x485   : > { %v1138_v25 = vpop.eup %1137 }
 0x486   : > { %v558_v36 = vmul.f32 %v1138_v25, %v1130_v17 }
 0x487   : > { %v794_v35 = vpop.xlane.xlu0 %793 }
 0x488   : > { %v559_v39 = vpack.c.bf16 %v558_v36, %v558_v36 }
 0x48b   : > { %v561_v37 = vpop.permute.xlu0 %560 }
 0x48c   : > { %v566_v38 = vsel %vm450_vm4, %v561_v37, 0 }
 0x48d   : > { %1059 = vmatpush3.bf16.msra.mxu0 %v566_v38 }
 0x48e   : > { %1070 = vmatprep.subr.bf16.mxu0 %v1151_v8 }
 0x490   : > { %1061 = vmatmul.mubr.msk.bf16.vlgmr.msra.gmra.mxu0 %vm386_vm2, %v559_v39 }
 0x491   : > { %1072 = vmatprep.mubr.msk.bf16.mxu0 %vm1152_vm1, %v1151_v8 }
 0x4a4   : > { %v675_v40 = vpop.xlane.xlu1 %674 }
 0x4a5   : > { %1139 = vrcp.f32 %v675_v40 }
 0x4a6   : > { %1141 = vrcp.f32 %v794_v35 }
 0x4a8   : > { %v680_v41 = vpop.permute.xlu1 %679 }
 0x4a9   : > { %v685_v42 = vsel %vm450_vm4, %v680_v41, 0 }
 0x4aa   : > { %1071 = vmatpush3.bf16.msra.mxu0 %v685_v42 }
 0x4ab   : > { %1082 = vmatprep.subr.bf16.mxu0 %v1151_v8 }
 0x4ac   : > { %v799_v45 = vpop.permute.xlu1 %798 }
 0x4ad   : > { %v804_v48 = vsel %vm450_vm4, %v799_v45, 0 }
 0x4b2   : > { %v1140_v43 = vpop.eup %1139 }
 0x4b3   : > { %v677_v44 = vmul.f32 %v1140_v43, %v1134_v26  ;;  %v1142_v47 = vpop.eup %1141 }
 0x4b4   : > { %v796_v49 = vmul.f32 %v1142_v47, %v1132_v20 }
 0x4b5   : > { %v678_v46 = vpack.c.bf16 %v677_v44, %v677_v44 }
 0x4b6   : > { %v797_v50 = vpack.c.bf16 %v796_v49, %v796_v49 }
 0x4b7   : > { %1073 = vmatmul.mubr.msk.bf16.vlgmr.msra.gmra.mxu0 %vm386_vm2, %v678_v46 }
 0x4b8   : > { %1083 = vmatpush3.bf16.msra.mxu0 %v804_v48  ;;  %1084 = vmatprep.mubr.msk.bf16.mxu0 %vm1152_vm1, %v1151_v8 }
 0x4bf   : > { %1085 = vmatmul.mubr.msk.bf16.vlgmr.msra.gmra.mxu0 %vm386_vm2, %v797_v50 }
 0x542   : > { %v488_v51 = vpop.f32.mrf.mxu0 }
 0x543   : > { %v494_v52 = vpack.c.bf16 %v488_v51, %v488_v51 }
 0x544   : > { %v1050_v53 = vpop.f32.mrf.mxu0 }
 0x545   : > { %496 = vst.msk [vmem:[#allocation2] sm:$0xf] %vm495_vm5, %v494_v52 }
 0x546   : > { %v491_v54 = vpop.f32.mrf.mxu0 }
 0x548   : > { %v1051_v55 = vpop.f32.mrf.mxu0 }
 0x550   : > { %v602_v56 = vpop.f32.mrf.mxu0 }
 0x551   : > { %v1007_v57 = vpack.c.bf16 %v602_v56, %v602_v56 }
 0x552   : > { %v1062_v58 = vpop.f32.mrf.mxu0 }
 0x553   : > { %612 = vrot.lane.b32.xlu0 %v1007_v57, %s1165_s8 }
 0x554   : > { %v605_v59 = vpop.f32.mrf.mxu0 }
 0x556   : > { %v1063_v60 = vpop.f32.mrf.mxu0 }
 0x577   : > { %v721_v62 = vpop.f32.mrf.mxu0 }
 0x578   : > { %v1008_v1 = vpack.c.bf16 %v721_v62, %v721_v62 }
 0x579   : > { %v1074_v2 = vpop.f32.mrf.mxu0 }
 0x57a   : > { %731 = vrot.lane.b32.xlu1 %v1008_v1, %s1166_s13 }
 0x57b   : > { %v724_v3 = vpop.f32.mrf.mxu0 }
 0x57d   : > { %v1075_v4 = vpop.f32.mrf.mxu0 }
 0x57f   : > { %v840_v5 = vpop.f32.mrf.mxu0 }
 0x580   : > { %v1009_v6 = vpack.c.bf16 %v840_v5, %v840_v5 }
 0x581   : > { %v1086_v7 = vpop.f32.mrf.mxu0 }
 0x582   : > { %850 = vrot.lane.b32.xlu0 %v1009_v6, %s1167_s14 }
 0x583   : > { %v843_v9 = vpop.f32.mrf.mxu0 }
 0x585   : > { %v1087_v10 = vpop.f32.mrf.mxu0 }
 0x5c5   : > { %v613_v11 = vpop.permute.xlu0 %612 }
 0x5c6   : > { %616 = vst.msk [vmem:[#allocation2] sm:$0xf] %vm615_vm6, %v613_v11 }
 0x5ec   : > { %v732_v12 = vpop.permute.xlu1 %731 }
 0x5ed   : > { %735 = vst.msk [vmem:[#allocation2] sm:$0xf] %vm734_vm7, %v732_v12 }
 0x5f4   : > { %v851_v8 = vpop.permute.xlu0 %850 }
 0x5f5   : > { %854 = vst.msk [vmem:[#allocation2] sm:$0xf] %vm853_vm8, %v851_v8 }
 0x5fc   : > { %v855_v13 = vld [vmem:[#allocation2] sm:$0xf] }
 0x5fd   : > { %1093 = vmatmul.mubr.msk.bf16.vlgmr.msra.gmra.mxu1 %vm278_vm0, %v855_v13 }
 0x6bd   : > { %v916_v15 = vpop.f32.mrf.mxu1 }
 0x6be   : > { %v917_v16 = vadd.f32 %v1001_v14, %v916_v15 }
 0x6bf   : > { %v1094_v17 = vpop.f32.mrf.mxu1 }
 0x6c0   : > { %v922_v18 = vadd.f32 %v917_v16, %v1224_v0 }
 0x6c1   : > { %v919_v19 = vpop.f32.mrf.mxu1 }
 0x6c2   : > { %923 = vst.msk [vmem:[%s273_s19] sm:$0xff] %vm278_vm0, %v922_v18 }
 0x6c3   : > { %v1095_v20 = vpop.f32.mrf.mxu1 }
 0x6c4 PF: > { %s17_s24 = sadd.s32 1, %s1149_s24  }
 0x6c5   : > { %p14_p4 = scmp.ge.s32.totalorder %s17_s24, 4  }
 0x6c7   :  { %16 = sbr.rel (!%p14_p4) target bundleno = 1 (0x1), region = 78 }

</bundles_post_ra>
